<compile_context>
chip_gen: v7x
topology: tpu7x:2x2x1
jax: 0.10.0
libtpu: 0.0.40
codegen_flags: <defaults>
</compile_context>

<pallas_src>
import itertools
from functools import partial

import jax
import jax.numpy as jnp
import numpy as np
from jax.experimental import pallas as pl
from jax.experimental.pallas import tpu as pltpu


# ----------------------------------------------------------------------------
# Glue: point_sample (bilinear sampling at normalized [0,1] coords, zero pad,
# align_corners=False).  Coordinates are SHARED across the leading dim, so we
# broadcast instead of tiling.  Kept in plain JAX (gather), vmapped over batch.
# ----------------------------------------------------------------------------
def point_sample(inp, coords):
    """inp: [M, C, H, W]; coords: [P, 2] in [0,1] shared across M. -> [M, C, P]."""
    M, C, H, W = inp.shape
    xg = coords[:, 0] * 2.0 - 1.0
    yg = coords[:, 1] * 2.0 - 1.0
    xf = (xg + 1.0) * W / 2.0 - 0.5
    yf = (yg + 1.0) * H / 2.0 - 0.5
    x0 = jnp.floor(xf)
    y0 = jnp.floor(yf)
    x1 = x0 + 1.0
    y1 = y0 + 1.0
    wx1 = xf - x0
    wx0 = 1.0 - wx1
    wy1 = yf - y0
    wy0 = 1.0 - wy1

    def gather(ix, iy):
        ixc = jnp.clip(ix, 0, W - 1).astype(jnp.int32)
        iyc = jnp.clip(iy, 0, H - 1).astype(jnp.int32)
        valid = ((ix >= 0) & (ix <= W - 1) & (iy >= 0) & (iy <= H - 1))
        vals = inp[:, :, iyc, ixc]                       # [M, C, P]
        return vals * valid.astype(inp.dtype)[None, None, :]

    return (gather(x0, y0) * (wx0 * wy0)[None, None, :]
            + gather(x1, y0) * (wx1 * wy0)[None, None, :]
            + gather(x0, y1) * (wx0 * wy1)[None, None, :]
            + gather(x1, y1) * (wx1 * wy1)[None, None, :])


# ----------------------------------------------------------------------------
# Pallas kernel: P-tiled cost matrix.
#   per P tile:  acc += concat([x, sigmoid(x), softplus(x)]) @ t^T   (one MXU op)
#                column `ones_col` of t is all ones -> row-sums land on the MXU.
#   finalize:    cost_mask  = (rowsum(softplus) - x@t) / P
#                cost_dice  = 1 - (2*sig@t + 1) / (rowsum(sig) + sum_t + 1)
#                cost_class = -softmax(logits) @ onehot^T   (exact division)
#                C = w_mask*cost_mask + w_class*cost_class + w_dice*cost_dice
# ----------------------------------------------------------------------------
def _make_cost_kernel(w_class, w_mask, w_dice, inv_P, ones_col, Qpad):
    def kernel(tgt_sums_ref, logits_ref, tgt_oh_ref, out_pts_ref, tgt_pts_ref,
               c_ref, acc_ref):
        p = pl.program_id(1)

        @pl.when(p == 0)
        def _():
            acc_ref[...] = jnp.zeros_like(acc_ref)

        x_bf = out_pts_ref[...]                           # [Qpad, Ptile] bf16
        t_bf = tgt_pts_ref[...]                           # [Npad, Ptile] bf16
        x = x_bf.astype(jnp.float32)

        # Shared exp(-|x|) feeds both softplus(x) and sigmoid(x).
        # (kept f32: safe on v5e; switchable to bf16 on v6e/v7x for ~2x EUP)
        ea = jnp.exp(-jnp.abs(x))
        softplus_x = jnp.maximum(x, 0.0) + jnp.log(1.0 + ea)
        inv_1pea = pl.reciprocal(1.0 + ea, approx=True)
        sig = jnp.where(x >= 0.0, inv_1pea, ea * inv_1pea)

        # Single stacked contraction against t (bf16 operands, f32 accumulate).
        lhs = jnp.concatenate(
            [x_bf, sig.astype(jnp.bfloat16), softplus_x.astype(jnp.bfloat16)],
            axis=0)                                       # [3*Qpad, Ptile]
        acc_ref[...] += jax.lax.dot_general(
            lhs, t_bf, (((1,), (1,)), ((), ())),
            preferred_element_type=jnp.float32)           # [3*Qpad, Npad]

        @pl.when(p == pl.num_programs(1) - 1)
        def _():
            acc = acc_ref[...]
            xt = acc[0:Qpad, :]                                        # x @ t
            sigt = acc[Qpad:2 * Qpad, :]                               # sig @ t
            # column `ones_col` of t is all-ones -> MXU row-sums over P
            sum_sig = acc[Qpad:2 * Qpad, ones_col:ones_col + 1]        # [Qpad,1]
            sum_sp = acc[2 * Qpad:3 * Qpad, ones_col:ones_col + 1]     # [Qpad,1]

            # sigmoid-CE:  sp(-x)@t + sp(x)@(1-t) == rowsum(sp(x)) - x@t
            cost_mask = (sum_sp - xt) * inv_P

            tsum = tgt_sums_ref[...]                                   # [1, Npad]
            denom = sum_sig + tsum + 1.0                               # [Qpad, Npad]
            cost_dice = 1.0 - (2.0 * sigt + 1.0) * pl.reciprocal(denom,
                                                                 approx=True)

            # classification cost (computed once; exact softmax normalization)
            logits = logits_ref[...].astype(jnp.float32)               # [Qpad, C]
            m = jnp.max(logits, axis=-1, keepdims=True)
            e = jnp.exp(logits - m)
            prob_un = jax.lax.dot_general(
                e.astype(jnp.bfloat16), tgt_oh_ref[...],
                (((1,), (1,)), ((), ())),
                preferred_element_type=jnp.float32)                    # [Qpad, Npad]
            cost_class = -(prob_un / jnp.sum(e, axis=-1, keepdims=True))

            c_ref[...] = (w_mask * cost_mask
                          + w_class * cost_class
                          + w_dice * cost_dice)
    return kernel


def compute_cost_matrices(tgt_sums, pred_logits, tgt_onehot, out_pts, tgt_pts,
                          *, P_real, ones_col,
                          w_class=1.0, w_mask=1.0, w_dice=1.0, p_tile=None):
    """tgt_sums [B,1,Npad] f32, pred_logits [B,Qpad,C] f32, tgt_onehot
       [B,Npad,C] bf16, out_pts [B,Qpad,Ppad] bf16, tgt_pts [B,Npad,Ppad] bf16
       -> cost matrices [B, Qpad, Npad] f32."""
    B, Qpad, C = pred_logits.shape
    Npad = tgt_onehot.shape[1]
    Ppad = out_pts.shape[-1]
    if p_tile is None:
        # 2048 fits comfortably under the 64 MiB VMEM of v7x with double
        # buffering + f32 elementwise temps; v5e/v6e (128 MiB) could go larger.
        p_tile = min(2048, Ppad)
    assert Ppad % p_tile == 0
    nP = Ppad // p_tile

    kernel = _make_cost_kernel(float(w_class), float(w_mask), float(w_dice),
                               1.0 / float(P_real), int(ones_col), int(Qpad))

    return pl.pallas_call(
        kernel,
        out_shape=jax.ShapeDtypeStruct((B, Qpad, Npad), jnp.float32),
        grid_spec=pltpu.PrefetchScalarGridSpec(
            num_scalar_prefetch=0,
            grid=(B, nP),
            in_specs=[
                # constant over the P axis -> stay resident, no re-DMA per tile
                pl.BlockSpec((None, 1, Npad), lambda b, p: (b, 0, 0)),
                pl.BlockSpec((None, Qpad, C), lambda b, p: (b, 0, 0)),
                pl.BlockSpec((None, Npad, C), lambda b, p: (b, 0, 0)),
                # P-tiled point tensors (the only big streaming inputs)
                pl.BlockSpec((None, Qpad, p_tile), lambda b, p: (b, 0, p)),
                pl.BlockSpec((None, Npad, p_tile), lambda b, p: (b, 0, p)),
            ],
            out_specs=pl.BlockSpec((None, Qpad, Npad), lambda b, p: (b, 0, 0)),
            scratch_shapes=[pltpu.VMEM((3 * Qpad, Npad), jnp.float32)]),
        compiler_params=pltpu.CompilerParams(
            dimension_semantics=("parallel", "arbitrary"),
            vmem_limit_bytes=32 * 1024 * 1024),
    )(tgt_sums, pred_logits, tgt_onehot, out_pts, tgt_pts)


# ----------------------------------------------------------------------------
# Jitted host glue: point sampling (vmapped over batch) + padding + kernel call.
# ----------------------------------------------------------------------------
@partial(jax.jit, static_argnames=("w_class", "w_mask", "w_dice"))
def _video_matcher_costs(pred_logits, pred_masks, tgt_masks, labels, coords,
                         *, w_class, w_mask, w_dice):
    B, Q, C = pred_logits.shape
    _, _, T, H, W = pred_masks.shape
    N = labels.shape[1]
    Pn = coords.shape[1]
    P_total = T * Pn

    out_pts = jax.vmap(point_sample)(pred_masks, coords).reshape(B, Q, P_total)
    tgt_pts = jax.vmap(point_sample)(tgt_masks.astype(pred_masks.dtype),
                                     coords).reshape(B, N, P_total)

    # --- padding ------------------------------------------------------------
    # Q: multiple of 16 (bf16 sublane packing); pad to 128 for production Q.
    Qpad = max(16, ((Q + 15) // 16) * 16)
    # N: multiple of 128 with room for one extra all-ones row (MXU rowsum trick)
    Npad = ((N + 1 + 127) // 128) * 128
    # P: multiple of the P tile; pad logits with a large negative so that
    # sigmoid/softplus of padded points are ~0 and contribute nothing.
    p_tile = min(2048, ((P_total + 127) // 128) * 128)
    Ppad = ((P_total + p_tile - 1) // p_tile) * p_tile
    NEG = -30.0

    out_pts = jnp.pad(out_pts, ((0, 0), (0, Qpad - Q), (0, Ppad - P_total)),
                      constant_values=NEG)

    # t-sums over P hoisted out of the kernel (cheap bandwidth-only XLA reduce)
    tgt_sums = jnp.sum(tgt_pts, axis=-1)                              # [B, N]
    tgt_sums = jnp.pad(tgt_sums, ((0, 0), (0, Npad - N)))[:, None, :]  # [B,1,Npad]

    # append an all-ones target row (row N) so the stacked matmul's column N
    # yields rowsum(sig) / rowsum(softplus) on the MXU
    ones_row = jnp.ones((B, 1, P_total), dtype=tgt_pts.dtype)
    tgt_pts_ext = jnp.concatenate([tgt_pts, ones_row], axis=1)        # [B,N+1,P]
    tgt_pts_ext = jnp.pad(tgt_pts_ext,
                          ((0, 0), (0, Npad - (N + 1)), (0, Ppad - P_total)))

    tgt_onehot = jax.nn.one_hot(labels, C, dtype=jnp.bfloat16)        # [B, N, C]
    tgt_onehot = jnp.pad(tgt_onehot, ((0, 0), (0, Npad - N), (0, 0)))

    logits_p = jnp.pad(pred_logits.astype(jnp.float32),
                       ((0, 0), (0, Qpad - Q), (0, 0)))

    c_full = compute_cost_matrices(
        tgt_sums.astype(jnp.float32),
        logits_p,
        tgt_onehot,
        out_pts.astype(jnp.bfloat16),
        tgt_pts_ext.astype(jnp.bfloat16),
        P_real=P_total, ones_col=N, p_tile=p_tile,
        w_class=w_class, w_mask=w_mask, w_dice=w_dice)
    return c_full[:, :Q, :N]


# ----------------------------------------------------------------------------
# Host-side glue: Hungarian assignment (exact brute force for small N)
# TODO(synk): linear_sum_assignment is data-dependent combinatorial host work
#             with no clean Pallas equivalent; brute force only works for tiny N.
# ----------------------------------------------------------------------------
def linear_sum_assignment_small(C):
    Q, N = C.shape
    best_rows, best_cost = None, np.inf
    for rows in itertools.permutations(range(Q), N):
        cost = sum(C[rows[j], j] for j in range(N))
        if cost < best_cost:
            best_cost, best_rows = cost, rows
    pairs = sorted(zip(best_rows, range(N)))
    return (np.array([p[0] for p in pairs], dtype=np.int64),
            np.array([p[1] for p in pairs], dtype=np.int64))


class VideoHungarianMatcher:
    def __init__(self, cost_class=1.0, cost_mask=1.0, cost_dice=1.0,
                 num_points=64):
        assert cost_class != 0 or cost_mask != 0 or cost_dice != 0
        self.cost_class = cost_class
        self.cost_mask = cost_mask
        self.cost_dice = cost_dice
        self.num_points = num_points

    def __call__(self, outputs, targets, rng):
        pred_logits = outputs["pred_logits"]          # [B, Q, C]
        pred_masks = outputs["pred_masks"]            # [B, Q, T, H, W]
        B, Q, C = pred_logits.shape

        # NOTE: assumes every batch element has the same number of targets N
        # (true for this test harness; real data would need padding + masking).
        labels = jnp.stack([t["labels"] for t in targets])      # [B, N]
        tgt_masks = jnp.stack([t["masks"] for t in targets])    # [B, N, T, H, W]

        # Shared random point coords per batch element (one RNG call).
        coords = jax.random.uniform(rng, (B, self.num_points, 2),
                                    dtype=jnp.float32)

        Cmat = _video_matcher_costs(
            pred_logits, pred_masks, tgt_masks, labels, coords,
            w_class=float(self.cost_class), w_mask=float(self.cost_mask),
            w_dice=float(self.cost_dice))
        Cmat = jax.block_until_ready(Cmat)

        indices = []
        Cnp = np.asarray(Cmat)
        for b in range(B):
            indices.append(linear_sum_assignment_small(Cnp[b]))
        return indices, Cmat


# ----------------------------------------------------------------------------
# Pure-JAX reference of the cost matrix (mirrors the PyTorch module, f32).
# ----------------------------------------------------------------------------
def _reference_cost(pred_logits, pred_masks, tgt_masks, labels, coords,
                    w_class, w_mask, w_dice):
    B, Q, C = pred_logits.shape
    N = labels.shape[1]
    out_pts = jax.vmap(point_sample)(pred_masks, coords).reshape(B, Q, -1)
    tgt_pts = jax.vmap(point_sample)(tgt_masks.astype(pred_masks.dtype),
                                     coords).reshape(B, N, -1)
    x = out_pts.astype(jnp.float32)
    t = tgt_pts.astype(jnp.float32)
    prob = jax.nn.softmax(pred_logits.astype(jnp.float32), axis=-1)
    oh = jax.nn.one_hot(labels, C, dtype=jnp.float32)
    cost_class = -jnp.einsum('bqc,bnc->bqn', prob, oh)
    P = x.shape[-1]
    sp = lambda z: jnp.maximum(z, 0.0) + jnp.log1p(jnp.exp(-jnp.abs(z)))
    cost_mask = (jnp.einsum('bqp,bnp->bqn', sp(-x), t)
                 + jnp.einsum('bqp,bnp->bqn', sp(x), 1.0 - t)) / P
    sig = jax.nn.sigmoid(x)
    num = 2.0 * jnp.einsum('bqp,bnp->bqn', sig, t)
    den = sig.sum(-1)[:, :, None] + t.sum(-1)[:, None, :]
    cost_dice = 1.0 - (num + 1.0) / (den + 1.0)
    return w_mask * cost_mask + w_class * cost_class + w_dice * cost_dice


if __name__ == "__main__":
    # Small deterministic setup consistent with the module's forward.
    B, Q, NUM_CLASSES = 2, 8, 7          # pred_logits last dim = num_classes+1 = 8
    T, H, W = 2, 16, 16
    N_TGT = 4
    NUM_POINTS = 64                      # flattened sample dim = T*64 = 128 (lane-dense)

    key = jax.random.PRNGKey(0)
    k1, k2, k3, k4, k5 = jax.random.split(key, 5)

    pred_logits = jax.random.normal(k1, (B, Q, NUM_CLASSES + 1), dtype=jnp.float32)
    pred_masks = jax.random.normal(k2, (B, Q, T, H, W), dtype=jnp.float32)

    targets = []
    for b in range(B):
        kl = jax.random.fold_in(k3, b)
        km = jax.random.fold_in(k4, b)
        labels = jax.random.randint(kl, (N_TGT,), 0, NUM_CLASSES)
        masks = (jax.random.uniform(km, (N_TGT, T, H, W)) > 0.5).astype(jnp.float32)
        targets.append({"labels": labels, "masks": masks})

    matcher = VideoHungarianMatcher(cost_class=2.0, cost_mask=5.0,
                                    cost_dice=5.0, num_points=NUM_POINTS)
    indices, Cmat = matcher({"pred_logits": pred_logits,
                             "pred_masks": pred_masks}, targets, rng=k5)
    Cmat = jax.block_until_ready(Cmat)

    assert Cmat.shape == (B, Q, N_TGT)
    assert np.all(np.isfinite(np.asarray(Cmat)))
    for i, j in indices:
        assert len(i) == len(j) == min(Q, N_TGT)

    # Numerical check against the pure-JAX (f32) reference; loose tolerance
    # absorbs bf16 matmul operands + approx reciprocals.
    coords = jax.random.uniform(k5, (B, NUM_POINTS, 2), dtype=jnp.float32)
    labels_s = jnp.stack([t["labels"] for t in targets])
    masks_s = jnp.stack([t["masks"] for t in targets])
    Cref = _reference_cost(pred_logits, pred_masks, masks_s, labels_s, coords,
                           2.0, 5.0, 5.0)
    np.testing.assert_allclose(np.asarray(Cmat), np.asarray(Cref),
                               atol=0.15, rtol=0.02)

    print("KERNEL_OK")
</pallas_src>

<mosaic_0001>
module attributes {stable_mosaic.version = 11 : i64} {
  func.func @kernel(%arg0: i32, %arg1: i32, %arg2: memref<1x1x128xf32, #tpu.memory_space<vmem>>, %arg3: memref<1x16x8xf32, #tpu.memory_space<vmem>>, %arg4: memref<1x128x8xbf16, #tpu.memory_space<vmem>>, %arg5: memref<1x16x128xbf16, #tpu.memory_space<vmem>>, %arg6: memref<1x128x128xbf16, #tpu.memory_space<vmem>>, %arg7: memref<1x16x128xf32, #tpu.memory_space<vmem>>, %arg8: memref<48x128xf32, #tpu.memory_space<vmem>>) attributes {dimension_semantics = [#tpu.dimension_semantics<parallel>, #tpu.dimension_semantics<arbitrary>], iteration_bounds = array<i64: 2, 1>, scalar_prefetch = 0 : i64, scratch_operands = 1 : i64, tpu.core_type = #tpu.core_type<tc>, window_params = [{transform_indices = @transform_0, window_bounds = array<i64: 1, 1, 128>}, {transform_indices = @transform_1, window_bounds = array<i64: 1, 16, 8>}, {transform_indices = @transform_2, window_bounds = array<i64: 1, 128, 8>}, {transform_indices = @transform_3, window_bounds = array<i64: 1, 16, 128>}, {transform_indices = @transform_4, window_bounds = array<i64: 1, 128, 128>}, {transform_indices = @transform_5, window_bounds = array<i64: 1, 16, 128>}]} {
    %c0_i32 = arith.constant 0 : i32
    %0 = arith.cmpi eq, %arg1, %c0_i32 : i32
    %1 = arith.extui %0 : i1 to i32
    %c0_i32_0 = arith.constant 0 : i32
    %2 = arith.cmpi ne, %1, %c0_i32_0 : i32
    scf.if %2 {
      %cst_17 = arith.constant 0.000000e+00 : f32
      %35 = vector.broadcast %cst_17 : f32 to vector<48x128xf32>
      %c0_18 = arith.constant 0 : index
      %c0_19 = arith.constant 0 : index
      %36 = vector.load %arg8[%c0_18, %c0_19] : memref<48x128xf32, #tpu.memory_space<vmem>>, vector<48x128xf32>
      tpu.vector_store %arg8[%c0_18, %c0_19], %35 {strides = array<i32>} : memref<48x128xf32, #tpu.memory_space<vmem>>, vector<48x128xf32>,
    } else {
    }
    %c0 = arith.constant 0 : index
    %c0_1 = arith.constant 0 : index
    %c0_2 = arith.constant 0 : index
    %3 = vector.load %arg5[%c0, %c0_1, %c0_2] : memref<1x16x128xbf16, #tpu.memory_space<vmem>>, vector<1x16x128xbf16>
    %4 = vector.shape_cast %3 : vector<1x16x128xbf16> to vector<16x128xbf16>
    %c0_3 = arith.constant 0 : index
    %c0_4 = arith.constant 0 : index
    %c0_5 = arith.constant 0 : index
    %5 = vector.load %arg6[%c0_3, %c0_4, %c0_5] : memref<1x128x128xbf16, #tpu.memory_space<vmem>>, vector<1x128x128xbf16>
    %6 = vector.shape_cast %5 : vector<1x128x128xbf16> to vector<128x128xbf16>
    %7 = arith.extf %4 : vector<16x128xbf16> to vector<16x128xf32>
    %8 = math.absf %7 : vector<16x128xf32>
    %cst = arith.constant 0.000000e+00 : f32
    %9 = vector.broadcast %cst : f32 to vector<16x128xf32>
    %10 = arith.subf %9, %8 : vector<16x128xf32>
    %11 = math.exp %10 : vector<16x128xf32>
    %cst_6 = arith.constant 0.000000e+00 : f32
    %12 = vector.broadcast %cst_6 : f32 to vector<16x128xf32>
    %13 = arith.maximumf %7, %12 : vector<16x128xf32>
    %cst_7 = arith.constant 1.000000e+00 : f32
    %14 = vector.broadcast %cst_7 : f32 to vector<16x128xf32>
    %15 = arith.addf %14, %11 : vector<16x128xf32>
    %16 = math.log %15 : vector<16x128xf32>
    %17 = arith.addf %13, %16 : vector<16x128xf32>
    %cst_8 = arith.constant 1.000000e+00 : f32
    %18 = vector.broadcast %cst_8 : f32 to vector<16x128xf32>
    %19 = arith.addf %18, %11 : vector<16x128xf32>
    %20 = tpu.reciprocal %19 {approx = true} : vector<16x128xf32> -> vector<16x128xf32>
    %cst_9 = arith.constant 0.000000e+00 : f32
    %21 = vector.broadcast %cst_9 : f32 to vector<16x128xf32>
    %22 = arith.cmpf oge, %7, %21 : vector<16x128xf32>
    %23 = arith.mulf %11, %20 : vector<16x128xf32>
    %24 = arith.select %22, %20, %23 : vector<16x128xi1>, vector<16x128xf32>
    %25 = arith.truncf %24 : vector<16x128xf32> to vector<16x128xbf16>
    %26 = arith.truncf %17 : vector<16x128xf32> to vector<16x128xbf16>
    %27 = tpu.concatenate %4, %25, %26 in 0 : vector<16x128xbf16>, vector<16x128xbf16>, vector<16x128xbf16> -> vector<48x128xbf16>
    %c0_10 = arith.constant 0 : index
    %c0_11 = arith.constant 0 : index
    %28 = vector.load %arg8[%c0_10, %c0_11] : memref<48x128xf32, #tpu.memory_space<vmem>>, vector<48x128xf32>
    %cst_12 = arith.constant dense<0.000000e+00> : vector<48x128xf32>
    %29 = tpu.matmul %27, %6, %cst_12 {dimension_numbers = #tpu.dot_dimension_numbers<[1], [1], [0], [0], [0, 0, 1, 0], [], []>} : vector<48x128xbf16>, vector<128x128xbf16>, vector<48x128xf32> -> vector<48x128xf32>
    %30 = arith.addf %28, %29 : vector<48x128xf32>
    %c0_13 = arith.constant 0 : index
    %c0_14 = arith.constant 0 : index
    %31 = vector.load %arg8[%c0_13, %c0_14] : memref<48x128xf32, #tpu.memory_space<vmem>>, vector<48x128xf32>
    tpu.vector_store %arg8[%c0_13, %c0_14], %30 {strides = array<i32>} : memref<48x128xf32, #tpu.memory_space<vmem>>, vector<48x128xf32>,
    %c0_i32_15 = arith.constant 0 : i32
    %32 = arith.cmpi eq, %arg1, %c0_i32_15 : i32
    %33 = arith.extui %32 : i1 to i32
    %c0_i32_16 = arith.constant 0 : i32
    %34 = arith.cmpi ne, %33, %c0_i32_16 : i32
    scf.if %34 {
      %c0_17 = arith.constant 0 : index
      %c0_18 = arith.constant 0 : index
      %35 = vector.load %arg8[%c0_17, %c0_18] : memref<48x128xf32, #tpu.memory_space<vmem>>, vector<48x128xf32>
      %36 = vector.extract_strided_slice %35 {offsets = [0, 0], sizes = [16, 128], strides = [1, 1]} : vector<48x128xf32> to vector<16x128xf32>
      %37 = vector.extract_strided_slice %35 {offsets = [16, 0], sizes = [16, 128], strides = [1, 1]} : vector<48x128xf32> to vector<16x128xf32>
      %38 = vector.extract_strided_slice %35 {offsets = [16, 4], sizes = [16, 1], strides = [1, 1]} : vector<48x128xf32> to vector<16x1xf32>
      %39 = vector.extract_strided_slice %35 {offsets = [32, 4], sizes = [16, 1], strides = [1, 1]} : vector<48x128xf32> to vector<16x1xf32>
      %40 = vector.broadcast %39 : vector<16x1xf32> to vector<16x128xf32>
      %41 = arith.subf %40, %36 : vector<16x128xf32>
      %cst_19 = arith.constant 7.812500e-03 : f32
      %42 = vector.broadcast %cst_19 : f32 to vector<16x128xf32>
      %43 = arith.mulf %41, %42 : vector<16x128xf32>
      %c0_20 = arith.constant 0 : index
      %c0_21 = arith.constant 0 : index
      %c0_22 = arith.constant 0 : index
      %44 = vector.load %arg2[%c0_20, %c0_21, %c0_22] : memref<1x1x128xf32, #tpu.memory_space<vmem>>, vector<1x1x128xf32>
      %45 = vector.shape_cast %44 : vector<1x1x128xf32> to vector<1x128xf32>
      %46 = vector.broadcast %38 : vector<16x1xf32> to vector<16x128xf32>
      %47 = vector.broadcast %45 : vector<1x128xf32> to vector<16x128xf32>
      %48 = arith.addf %46, %47 : vector<16x128xf32>
      %cst_23 = arith.constant 1.000000e+00 : f32
      %49 = vector.broadcast %cst_23 : f32 to vector<16x128xf32>
      %50 = arith.addf %48, %49 : vector<16x128xf32>
      %cst_24 = arith.constant 2.000000e+00 : f32
      %51 = vector.broadcast %cst_24 : f32 to vector<16x128xf32>
      %52 = arith.mulf %51, %37 : vector<16x128xf32>
      %cst_25 = arith.constant 1.000000e+00 : f32
      %53 = vector.broadcast %cst_25 : f32 to vector<16x128xf32>
      %54 = arith.addf %52, %53 : vector<16x128xf32>
      %55 = tpu.reciprocal %50 {approx = true} : vector<16x128xf32> -> vector<16x128xf32>
      %56 = arith.mulf %54, %55 : vector<16x128xf32>
      %cst_26 = arith.constant 1.000000e+00 : f32
      %57 = vector.broadcast %cst_26 : f32 to vector<16x128xf32>
      %58 = arith.subf %57, %56 : vector<16x128xf32>
      %c0_27 = arith.constant 0 : index
      %c0_28 = arith.constant 0 : index
      %c0_29 = arith.constant 0 : index
      %59 = vector.load %arg3[%c0_27, %c0_28, %c0_29] : memref<1x16x8xf32, #tpu.memory_space<vmem>>, vector<1x16x8xf32>
      %60 = vector.shape_cast %59 : vector<1x16x8xf32> to vector<16x8xf32>
      %cst_30 = arith.constant dense<0xFF800000> : vector<16xf32>
      %61 = vector.multi_reduction <maximumf>, %60, %cst_30 [1] : vector<16x8xf32> to vector<16xf32>
      %62 = vector.shape_cast %61 : vector<16xf32> to vector<16x1xf32>
      %63 = vector.broadcast %62 : vector<16x1xf32> to vector<16x8xf32>
      %64 = arith.subf %60, %63 : vector<16x8xf32>
      %65 = math.exp %64 : vector<16x8xf32>
      %66 = arith.truncf %65 : vector<16x8xf32> to vector<16x8xbf16>
      %c0_31 = arith.constant 0 : index
      %c0_32 = arith.constant 0 : index
      %c0_33 = arith.constant 0 : index
      %67 = vector.load %arg4[%c0_31, %c0_32, %c0_33] : memref<1x128x8xbf16, #tpu.memory_space<vmem>>, vector<1x128x8xbf16>
      %68 = vector.shape_cast %67 : vector<1x128x8xbf16> to vector<128x8xbf16>
      %cst_34 = arith.constant dense<0.000000e+00> : vector<16x128xf32>
      %69 = tpu.matmul %66, %68, %cst_34 {dimension_numbers = #tpu.dot_dimension_numbers<[1], [1], [0], [0], [0, 0, 1, 0], [], []>} : vector<16x8xbf16>, vector<128x8xbf16>, vector<16x128xf32> -> vector<16x128xf32>
      %cst_35 = arith.constant dense<0.000000e+00> : vector<16xf32>
      %70 = vector.multi_reduction <add>, %65, %cst_35 [1] : vector<16x8xf32> to vector<16xf32>
      %71 = vector.shape_cast %70 : vector<16xf32> to vector<16x1xf32>
      %72 = vector.broadcast %71 : vector<16x1xf32> to vector<16x128xf32>
      %73 = arith.divf %69, %72 : vector<16x128xf32>
      %cst_36 = arith.constant 0.000000e+00 : f32
      %74 = vector.broadcast %cst_36 : f32 to vector<16x128xf32>
      %75 = arith.subf %74, %73 : vector<16x128xf32>
      %cst_37 = arith.constant 5.000000e+00 : f32
      %76 = vector.broadcast %cst_37 : f32 to vector<16x128xf32>
      %77 = arith.mulf %76, %43 : vector<16x128xf32>
      %cst_38 = arith.constant 2.000000e+00 : f32
      %78 = vector.broadcast %cst_38 : f32 to vector<16x128xf32>
      %79 = arith.mulf %78, %75 : vector<16x128xf32>
      %80 = arith.addf %77, %79 : vector<16x128xf32>
      %cst_39 = arith.constant 5.000000e+00 : f32
      %81 = vector.broadcast %cst_39 : f32 to vector<16x128xf32>
      %82 = arith.mulf %81, %58 : vector<16x128xf32>
      %83 = arith.addf %80, %82 : vector<16x128xf32>
      %c0_40 = arith.constant 0 : index
      %c0_41 = arith.constant 0 : index
      %c0_42 = arith.constant 0 : index
      %84 = vector.load %arg7[%c0_40, %c0_41, %c0_42] : memref<1x16x128xf32, #tpu.memory_space<vmem>>, vector<1x16x128xf32>
      %85 = vector.shape_cast %84 : vector<1x16x128xf32> to vector<16x128xf32>
      %86 = vector.shape_cast %83 : vector<16x128xf32> to vector<1x16x128xf32>
      tpu.vector_store %arg7[%c0_40, %c0_41, %c0_42], %86 {strides = array<i32>} : memref<1x16x128xf32, #tpu.memory_space<vmem>>, vector<1x16x128xf32>,
    } else {
    }
    return
  }
  func.func @transform_0(%arg0: i32, %arg1: i32) -> (i32, i32, i32) {
    %c0_i32 = arith.constant 0 : i32
    %c0_i32_0 = arith.constant 0 : i32
    %c0_i32_1 = arith.constant 0 : i32
    return %arg0, %c0_i32, %c0_i32_0 : i32, i32, i32
  }
  func.func @transform_1(%arg0: i32, %arg1: i32) -> (i32, i32, i32) {
    %c0_i32 = arith.constant 0 : i32
    %c0_i32_0 = arith.constant 0 : i32
    %c0_i32_1 = arith.constant 0 : i32
    return %arg0, %c0_i32, %c0_i32_0 : i32, i32, i32
  }
  func.func @transform_2(%arg0: i32, %arg1: i32) -> (i32, i32, i32) {
    %c0_i32 = arith.constant 0 : i32
    %c0_i32_0 = arith.constant 0 : i32
    %c0_i32_1 = arith.constant 0 : i32
    return %arg0, %c0_i32, %c0_i32_0 : i32, i32, i32
  }
  func.func @transform_3(%arg0: i32, %arg1: i32) -> (i32, i32, i32) {
    %c0_i32 = arith.constant 0 : i32
    %c0_i32_0 = arith.constant 0 : i32
    return %arg0, %c0_i32, %arg1 : i32, i32, i32
  }
  func.func @transform_4(%arg0: i32, %arg1: i32) -> (i32, i32, i32) {
    %c0_i32 = arith.constant 0 : i32
    %c0_i32_0 = arith.constant 0 : i32
    return %arg0, %c0_i32, %arg1 : i32, i32, i32
  }
  func.func @transform_5(%arg0: i32, %arg1: i32) -> (i32, i32, i32) {
    %c0_i32 = arith.constant 0 : i32
    %c0_i32_0 = arith.constant 0 : i32
    %c0_i32_1 = arith.constant 0 : i32
    return %arg0, %c0_i32, %c0_i32_0 : i32, i32, i32
  }
}

</mosaic_0001>

<bundles_post_ra>
// kernel: _video_matcher_costs.1
= control target key start
LH: loop header
LB: loop body
LE: loop exit
PB: predicated region body
PF: predicated region fallthrough
CT: control target
= control target key end

     0   :  { %s1096_s18 = smov 0   ;;  %s1098_s19 = smov 0   ;;  %s1231_s0 = inlined_call_operand.vmem [shape: f32[2,1,128], index: 0, kind: input, shape index: {}]   ;;  %s1232_s1 = inlined_call_operand.vmem [shape: f32[2,16,8], index: 1, kind: input, shape index: {}]   ;;  %s1233_s2 = inlined_call_operand.vmem [shape: bf16[2,128,8], index: 2, kind: input, shape index: {}]   ;;  %s1234_s3 = inlined_call_operand.vmem [shape: bf16[2,16,128], index: 3, kind: input, shape index: {}]   ;;  %s1235_s4 = inlined_call_operand.vmem [shape: bf16[2,128,128], index: 4, kind: input, shape index: {}]   ;;  %s1236_s5 = inlined_call_operand.vmem [shape: f32[2,16,128], index: 5, kind: output, shape index: {}]  }
   0x1   :  { %s1100_s20 = smov 0  }
   0x2 LB: > { %s27_s21 = sadd.s32 1, %s1057_s19  ;;  %p863_p0 = scmp.ge.s32.totalorder %s1061_s20, 1  ;;  %s1061_s20 = sphi %s1100_s20, %s15_s20   ;;  %s1057_s19 = sphi %s1098_s19, %s1238_s19   ;;  %s1053_s18 = sphi %s1096_s18, %s1237_s18  }
   0x3   : > { %p29_p1 = scmp.ge.s32.totalorder %s27_s21, 2  ;;  %p247_p2 = scmp.lt.s32.totalorder %s1061_s20, 3 }
   0x5   : > { %s1240_s21 = smov (%p29_p1, %s27_s21), 0  ;;  %p248_p3 = pnand %p863_p0, %p247_p2 }
   0x6   : > { %p299_p4 = scmp.lt.s32.totalorder (!%p248_p3), %s1053_s18, 1  ;;  %v1063_v0 = vmov (!%p248_p3), 0.0   ;;  %vm1064_vm0 = vmmov (!%p248_p3), 0   ;;  %vm577_vm1 = vcmask (!%p248_p3), 64512  }
   0x7   : > { %251 = sbr.rel (%p248_p3) target bundleno = 456 (0x1c8), region = 40  ;;  %920 = vmatprep.subr.bf16.mxu0 (!%p248_p3), %v1063_v0  ;;  %936 = vmatprep.mubr.msk.bf16.mxu0 (!%p248_p3), %vm1064_vm0, %v1063_v0 }
   0x8   : > { %948 = vmatprep.subr.bf16.mxu1 (!%p248_p3), %v1063_v0  ;;  %964 = vmatprep.mubr.msk.bf16.mxu1 (!%p248_p3), %vm1064_vm0, %v1063_v0 }
   0xe   : > { %s1242_s18 = smov (!%p299_p4, %s1053_s18), 1 }
   0xf   : > { %s895_s22 = sshll.u32 %s1242_s18, 4  ;;  %s896_s23 = sshll.u32 %s1242_s18, 6 }
  0x10   : > { %s306_s26 = scalar_lea.vmem %s1232_s1, %s895_s22  ;;  %s1132_s29 = scalar_lea.vmem %s1233_s2, %s896_s23 }
  0x11   : > { %s1137_s7 = scalar_lea.vmem %s1235_s4, %s896_s23  ;;  %v1139_v1 = vld [vmem:[%s306_s26] sm:$0xff]  ;;  %v1141_v2 = vld [vmem:[%s306_s26 + $0x8] sm:$0xff]  ;;  %s897_s8 = sshll.u32 %s1242_s18, 3  ;;  %v1008_v17 = vld [vmem:[%s1132_s29 + $0x10] sm:$0xff]  }
  0x12   : > { %v578_v3 = vsel %vm577_vm1, %v1139_v1, -inf  ;;  %v997_v4 = vld [vmem:[%s1137_s7] sm:$0xff]   ;;  %v581_v5 = vsel %vm577_vm1, %v1141_v2, -inf  ;;  %v998_v6 = vld [vmem:[%s1137_s7 + $0x8] sm:$0xff]   ;;  %s319_s11 = scalar_lea.vmem %s1234_s3, %s897_s8  ;;  %v999_v11 = vld [vmem:[%s1137_s7 + $0x10] sm:$0xff]   ;;  %v657_v21 = vsel %vm577_vm1, %v1008_v17, 0  ;;  %s301_s14 = scalar_lea.vmem %s1231_s0, %s1242_s18 }
  0x13   : > { %579 = vmax.xlane.f32.xlu0 %v578_v3  ;;  %921 = vmatpush3.bf16.xpose.msra.mxu0 %v997_v4  ;;  %v1006_v7 = vld [vmem:[%s1132_s29] sm:$0xff]   ;;  %v1007_v10 = vld [vmem:[%s1132_s29 + $0x8] sm:$0xff]   ;;  %v1000_v18 = vld [vmem:[%s1137_s7 + $0x18] sm:$0xff]   ;;  %v1065_v3 = vmov 4   ;;  %s332_s17 = scalar_lea.vmem %s1236_s5, %s895_s22 }
  0x14   : > { %922 = vmatprep.subr.bf16.mxu0 %v1063_v0  ;;  %v651_v8 = vsel %vm577_vm1, %v1006_v7, 0  ;;  %v1157_v9 = vld [vmem:[%s319_s11] sm:$0xff]   ;;  %v654_v14 = vsel %vm577_vm1, %v1007_v10, 0  ;;  %v1009_v24 = vld [vmem:[%s1132_s29 + $0x18] sm:$0xff]   ;;  %v1002_v28 = vld [vmem:[%s1137_s7 + $0x28] sm:$0xff]   ;;  %995 = vset.pattern.permute.xlu0 %v1065_v3 }
  0x15   : > { %949 = vmatpush3.bf16.xpose.msra.mxu1 %v651_v8  ;;  %v1163_v12 = vunpack.c.l.bf16 %v1157_v9  ;;  %v1166_v13 = vunpack.c.h.bf16 %v1157_v9  ;;  %v1001_v25 = vld [vmem:[%s1137_s7 + $0x20] sm:$0xff]   ;;  %v660_v26 = vsel %vm577_vm1, %v1009_v24, 0  ;;  %v1011_v33 = vld [vmem:[%s1132_s29 + $0x28] sm:$0xff]   ;;  %v1003_v35 = vld [vmem:[%s1137_s7 + $0x30] sm:$0xff]   ;;  %996 = vset.pattern.permute.xlu1 %v1065_v3 }
  0x16   : > { %950 = vmatprep.subr.bf16.mxu1 %v1063_v0  ;;  %v1010_v27 = vld [vmem:[%s1132_s29 + $0x20] sm:$0xff]   ;;  %v666_v36 = vsel %vm577_vm1, %v1011_v33, 0  ;;  %v1012_v37 = vld [vmem:[%s1132_s29 + $0x30] sm:$0xff]   ;;  %v1004_v38 = vld [vmem:[%s1137_s7 + $0x38] sm:$0xff]  }
  0x17   : > { %582 = vmax.xlane.f32.xlu0 %v581_v5  ;;  %v364_v15 = vand.u32 2147483647, %v1163_v12  ;;  %v365_v16 = vand.u32 2147483647, %v1166_v13  ;;  %v663_v29 = vsel %vm577_vm1, %v1010_v27, 0  ;;  %v669_v39 = vsel %vm577_vm1, %v1012_v37, 0 }
  0x18   : > { %v1013_v42 = vld [vmem:[%s1132_s29 + $0x38] sm:$0xff]   ;;  %vm384_vm2 = vcmp.ge.f32.partialorder %v1163_v12, 0.0  ;;  %vm385_vm3 = vcmp.ge.f32.partialorder %v1166_v13, 0.0  ;;  %v372_v50 = vmax.f32 %v1163_v12, 0.0  ;;  %v373_v52 = vmax.f32 %v1166_v13, 0.0 }
  0x19   : > { %v366_v19 = vsub.f32 0.0, %v364_v15  ;;  %v367_v20 = vsub.f32 0.0, %v365_v16  ;;  %v672_v45 = vsel %vm577_vm1, %v1013_v42, 0  ;;  %v883_v24 = vld [vmem:[%s301_s14] ss:$0 sm:$0xff] }
  0x1b   : > { %923 = vmatpush3.bf16.xpose.msra.mxu0 %v998_v6  ;;  %v368_v22 = vmul.f32 1.442695, %v366_v19  ;;  %v370_v23 = vmul.f32 1.442695, %v367_v20 }
  0x1c   : > { %924 = vmatprep.subr.bf16.mxu0 %v1063_v0 }
  0x1d   : > { %951 = vmatpush3.bf16.xpose.msra.mxu1 %v654_v14  ;;  %1015 = vpow2.f32 %v368_v22 }
  0x1e   : > { %952 = vmatprep.subr.bf16.mxu1 %v1063_v0  ;;  %1017 = vpow2.f32 %v370_v23 }
  0x23   : > { %925 = vmatpush3.bf16.xpose.msra.mxu0 %v999_v11 }
  0x24   : > { %926 = vmatprep.subr.bf16.mxu0 %v1063_v0 }
  0x25   : > { %953 = vmatpush3.bf16.xpose.msra.mxu1 %v657_v21 }
  0x26   : > { %954 = vmatprep.subr.bf16.mxu1 %v1063_v0 }
  0x27   : > { %v1016_v30 = vpop.eup %1015 }
  0x28   : > { %v1018_v31 = vpop.eup %1017  ;;  %v374_v32 = vadd.f32 1.0, %v1016_v30 }
  0x29   : > { %v375_v34 = vadd.f32 1.0, %v1018_v31 }
  0x2a   : > { %1019 = vrcp.f32 %v374_v32 }
  0x2b   : > { %927 = vmatpush3.bf16.xpose.msra.mxu0 %v1000_v18  ;;  %1021 = vrcp.f32 %v375_v34 }
  0x2c   : > { %928 = vmatprep.subr.bf16.mxu0 %v1063_v0  ;;  %1023 = vlog2.f32 %v374_v32 }
  0x2d   : > { %955 = vmatpush3.bf16.xpose.msra.mxu1 %v660_v26  ;;  %1025 = vlog2.f32 %v375_v34 }
  0x2e   : > { %956 = vmatprep.subr.bf16.mxu1 %v1063_v0 }
  0x33   : > { %929 = vmatpush3.bf16.xpose.msra.mxu0 %v1001_v25 }
  0x34   : > { %930 = vmatprep.subr.bf16.mxu0 %v1063_v0  ;;  %v1020_v40 = vpop.eup %1019 }
  0x35   : > { %957 = vmatpush3.bf16.xpose.msra.mxu1 %v663_v29  ;;  %v1022_v41 = vpop.eup %1021  ;;  %v386_v43 = vmul.f32 %v1020_v40, %v1016_v30 }
  0x36   : > { %958 = vmatprep.subr.bf16.mxu1 %v1063_v0  ;;  %v387_v44 = vmul.f32 %v1022_v41, %v1018_v31  ;;  %v1024_v46 = vpop.eup %1023 }
  0x37   : > { %v1026_v47 = vpop.eup %1025  ;;  %v388_v48 = vsel %vm384_vm2, %v1020_v40, %v386_v43  ;;  %v377_v53 = vmul.f32 0.6931472, %v1024_v46 }
  0x38   : > { %v389_v49 = vsel %vm385_vm3, %v1022_v41, %v387_v44  ;;  %v379_v54 = vmul.f32 0.6931472, %v1026_v47 }
  0x39   : > { %v390_v51 = vpack.c.bf16 %v389_v49, %v388_v48  ;;  %v380_v55 = vadd.f32 %v377_v53, %v372_v50 }
  0x3a   : > { %v381_v56 = vadd.f32 %v379_v54, %v373_v52 }
  0x3b   : > { %931 = vmatpush3.bf16.xpose.msra.mxu0 %v1002_v28 }
  0x3c   : > { %932 = vmatprep.subr.bf16.mxu0 %v1063_v0  ;;  %v391_v57 = vpack.c.bf16 %v381_v56, %v380_v55 }
  0x3d   : > { %959 = vmatpush3.bf16.xpose.msra.mxu1 %v666_v36 }
  0x3e   : > { %960 = vmatprep.subr.bf16.mxu1 %v1063_v0 }
  0x43   : > { %933 = vmatpush3.bf16.xpose.msra.mxu0 %v1003_v35 }
  0x44   : > { %934 = vmatprep.subr.bf16.mxu0 %v1063_v0 }
  0x45   : > { %961 = vmatpush3.bf16.xpose.msra.mxu1 %v669_v39 }
  0x46   : > { %962 = vmatprep.subr.bf16.mxu1 %v1063_v0 }
  0x4b   : > { %935 = vmatpush3.bf16.xpose.msra.mxu0 %v1004_v38 }
  0x4d   : > { %963 = vmatpush3.bf16.xpose.msra.mxu1 %v672_v45 }
  0x52   : > { %937 = vmatmul.mubr.bf16.vlgmr.msra.gmra.mrb[0].mxu0 %v1157_v9 }
  0x53   : > { %940 = vmatprep.mubr.msk.bf16.mxu0 %vm1064_vm0, %v1063_v0 }
  0x5a   : > { %941 = vmatmul.mubr.bf16.gmra.mrb[4].mxu0 %v390_v51 }
  0x5b   : > { %944 = vmatprep.mubr.msk.bf16.mxu0 %vm1064_vm0, %v1063_v0 }
  0x62   : > { %945 = vmatmul.mubr.bf16.gmra.mrb[8].mxu0 %v391_v57 }
  0xa0   : > { %v580_v58 = vpop.xlane.xlu0 %579 }
  0xa1   : > { %v584_v59 = vsub.f32 %v1139_v1, %v580_v58 }
  0xa3   : > { %v586_v60 = vmul.f32 1.442695, %v584_v59 }
  0xa4   : > { %v583_v61 = vpop.xlane.xlu0 %582 }
  0xa5   : > { %1027 = vpow2.f32 %v586_v60  ;;  %v585_v62 = vsub.f32 %v1141_v2, %v583_v61 }
  0xa7   : > { %v588_v63 = vmul.f32 1.442695, %v585_v62 }
  0xa9   : > { %1029 = vpow2.f32 %v588_v63 }
  0xaf   : > { %v1028_v4 = vpop.eup %1027 }
  0xb0   : > { %v715_v5 = vsel %vm577_vm1, %v1028_v4, 0.0 }
  0xb1   : > { %716 = vadd.xlane.f32.xlu1 %v715_v5 }
  0xb3   : > { %v1030_v0 = vpop.eup %1029 }
  0xb4   : > { %v590_v6 = vpack.c.bf16 %v1030_v0, %v1028_v4  ;;  %v718_v7 = vsel %vm577_vm1, %v1030_v0, 0.0 }
  0xb5   : > { %719 = vadd.xlane.f32.xlu1 %v718_v7 }
  0xb6   : > { %965 = vmatmul.mubr.msk.bf16.vlgmr.msra.gmra.mrb[0].mxu1 %vm577_vm1, %v590_v6 }
 0x125   : > { %v486_v1 = vpop.f32.mrb[0].mxu0 }
 0x126   : > { %v938_v8 = vpop.f32.mrb[1].mxu0 }
 0x127   : > { %v489_v9 = vpop.f32.mrb[2].mxu0 }
 0x128   : > { %v939_v2 = vpop.f32.mrb[3].mxu0 }
 0x12d   : > { %v494_v10 = vpop.f32.mrb[4].mxu0 }
 0x12e   : > { %v942_v11 = vpop.f32.mrb[5].mxu0  ;;  %547 = vperm.xlu0 %995, %v494_v10   ;;  %v565_v38 = vmul.f32 2.0, %v494_v10 }
 0x12f   : > { %v497_v12 = vpop.f32.mrb[6].mxu0 }
 0x130   : > { %v943_v13 = vpop.f32.mrb[7].mxu0  ;;  %552 = vperm.xlu1 %996, %v497_v12   ;;  %v566_v40 = vmul.f32 2.0, %v497_v12  ;;  %v567_v46 = vadd.f32 1.0, %v565_v38 }
 0x132   : > { %v568_v50 = vadd.f32 1.0, %v566_v40 }
 0x135   : > { %v502_v14 = vpop.f32.mrb[8].mxu0 }
 0x136   : > { %v946_v15 = vpop.f32.mrb[9].mxu0  ;;  %532 = vperm.xlu1 %996, %v502_v14  }
 0x137   : > { %v505_v16 = vpop.f32.mrb[10].mxu0 }
 0x138   : > { %v947_v17 = vpop.f32.mrb[11].mxu0 }
 0x13a   : > { %537 = vperm.xlu1 %996, %v505_v16  }
 0x13e   : > { %v717_v22 = vpop.xlane.xlu1 %716 }
 0x13f   : > { %1031 = vrcp.f32 %v717_v22 }
 0x142   : > { %v720_v23 = vpop.xlane.xlu1 %719 }
 0x143   : > { %1033 = vrcp.f32 %v720_v23 }
 0x149   : > { %v1032_v30 = vpop.eup %1031 }
 0x14d   : > { %v1034_v33 = vpop.eup %1033 }
 0x189   : > { %v708_v18 = vpop.f32.mrb[0].mxu1 }
 0x18a   : > { %v966_v19 = vpop.f32.mrb[1].mxu1  ;;  %v722_v31 = vmul.f32 %v1032_v30, %v708_v18 }
 0x18b   : > { %v711_v20 = vpop.f32.mrb[2].mxu1 }
 0x18c   : > { %v967_v21 = vpop.f32.mrb[3].mxu1  ;;  %v725_v35 = vsub.f32 0.0, %v722_v31  ;;  %v724_v36 = vmul.f32 %v1034_v33, %v711_v20 }
 0x18e   : > { %v729_v42 = vmul.f32 2.0, %v725_v35  ;;  %v726_v43 = vsub.f32 0.0, %v724_v36 }
 0x190   : > { %v730_v53 = vmul.f32 2.0, %v726_v43 }
 0x1ad   : > { %v548_v25 = vpop.permute.xlu0 %547 }
 0x1ae   : > { %v561_v26 = vadd.f32 %v883_v24, %v548_v25 }
 0x1af   : > { %v553_v27 = vpop.permute.xlu1 %552 }
 0x1b0   : > { %v563_v28 = vadd.f32 1.0, %v561_v26  ;;  %v562_v29 = vadd.f32 %v883_v24, %v553_v27 }
 0x1b2   : > { %1035 = vrcp.f32 %v563_v28  ;;  %v564_v32 = vadd.f32 1.0, %v562_v29 }
 0x1b4   : > { %1037 = vrcp.f32 %v564_v32 }
 0x1b5   : > { %v533_v34 = vpop.permute.xlu1 %532 }
 0x1b6   : > { %v540_v37 = vsub.f32 %v533_v34, %v486_v1 }
 0x1b8   : > { %v542_v39 = vmul.f32 0.0078125, %v540_v37 }
 0x1b9   : > { %v538_v41 = vpop.permute.xlu1 %537 }
 0x1ba   : > { %v727_v44 = vmul.f32 5.0, %v542_v39  ;;  %v541_v45 = vsub.f32 %v538_v41, %v489_v9 }
 0x1bc   : > { %v1036_v47 = vpop.eup %1035  ;;  %v731_v48 = vadd.f32 %v729_v42, %v727_v44  ;;  %v543_v49 = vmul.f32 0.0078125, %v541_v45 }
 0x1bd   : > { %v571_v51 = vmul.f32 %v1036_v47, %v567_v46 }
 0x1be   : > { %v1038_v52 = vpop.eup %1037  ;;  %v728_v54 = vmul.f32 5.0, %v543_v49 }
 0x1bf   : > { %v573_v55 = vsub.f32 1.0, %v571_v51  ;;  %v572_v56 = vmul.f32 %v1038_v52, %v568_v50 }
 0x1c0   : > { %v732_v57 = vadd.f32 %v730_v53, %v728_v54 }
 0x1c1   : > { %v733_v58 = vmul.f32 5.0, %v573_v55  ;;  %v574_v59 = vsub.f32 1.0, %v572_v56 }
 0x1c3   : > { %v735_v60 = vadd.f32 %v733_v58, %v731_v48  ;;  %v734_v61 = vmul.f32 5.0, %v574_v59 }
 0x1c5   : > { %737 = vst [vmem:[%s332_s17] sm:$0xff] %v735_v60  ;;  %v736_v62 = vadd.f32 %v734_v61, %v732_v57 }
 0x1c7   : > { %738 = vst [vmem:[%s332_s17 + $0x8] sm:$0xff] %v736_v62 }
 0x1c8 PF: > { %s15_s20 = sadd.s32 1, %s1061_s20   ;;  %s1237_s18 = smov %s1057_s19 }
 0x1c9   : > { %p12_p5 = scmp.ge.s32.totalorder %s15_s20, 4   ;;  %s1238_s19 = smov %s1240_s21 }
 0x1cb   :  { %14 = sbr.rel (!%p12_p5) target bundleno = 2 (0x2), region = 90 }

</bundles_post_ra>
